<compile_context>
chip_gen: v5e
topology: v5e:2x2
jax: 0.10.0
libtpu: 0.0.40
codegen_flags: <defaults>
</compile_context>

<pallas_src>
import functools

import jax
import jax.numpy as jnp
from jax import lax
from jax.experimental import pallas as pl
from jax.experimental.pallas import tpu as pltpu


# ----------------------------- Pallas kernels ------------------------------

def _bn_relu_mean_kernel(x_ref, scale_ref, shift_ref, valid_ref, y_ref, avg_ref,
                         *, inv_count):
    """BatchNorm(eval) + ReLU + spatial mean on the padded/flattened layout.

    x:     (1, C, Sp)  raw input, zero-padded spatially, flattened (Sp on lanes)
    scale: (C, 1)      gamma / sqrt(var + eps)
    shift: (C, 1)      beta - mean * scale
    valid: (1, Sp)     1.0 at interior positions, 0.0 at padding positions
    y:     (1, C, Sp)  relu(bn(x)) with padding forced to 0 (conv-ready layout)
    avg:   (1, C, 1)   mean over the unpadded spatial extent
    """
    y = jnp.maximum(x_ref[0] * scale_ref[...] + shift_ref[...], 0.0) * valid_ref[...]
    y_ref[0] = y
    avg_ref[0] = jnp.sum(y, axis=-1, keepdims=True) * inv_count


def _conv_taps_kernel(xp_ref, wm_ref, out_ref, *, tap_offsets, l_valid):
    """Grouped conv3d as k^3 shifted-window matmuls (implicit im2col).

    xp:  (1, C, Sp)          padded BN+ReLU activation for one batch
    wm:  (1, C_out, K3*C)    per-tap weights with the per-head gate folded in,
                             output channels pre-ordered as o*heads + h
    out: (1, C_out, Sp)      lane-dense output in padded-flat coordinates
                             (valid positions extracted in the wrapper)
    """
    c_in = xp_ref.shape[1]
    c_out, sp = out_ref.shape[1], out_ref.shape[2]

    xv = xp_ref[0]                                    # (C, Sp), loaded once
    wv = wm_ref[0]                                    # (C_out, K3*C)

    acc = jnp.zeros((c_out, l_valid), jnp.float32)
    for t, off in enumerate(tap_offsets):             # unrolled over K3 taps
        w_t = wv[:, t * c_in:(t + 1) * c_in]          # (C_out, C)
        acc = acc + jnp.dot(w_t, xv[:, off:off + l_valid],
                            preferred_element_type=jnp.float32)

    out_ref[0, :, :l_valid] = acc.astype(out_ref.dtype)
    if sp > l_valid:                                  # zero the unused tail
        out_ref[0, :, l_valid:] = jnp.zeros((c_out, sp - l_valid), out_ref.dtype)


# -------------------------------- wrapper -----------------------------------

def dynamic_multi_head_conv(x, params, *, heads, stride, padding, dilation,
                            inactive_channels=0):
    B, C, D, H, W = x.shape
    eps = 1e-5
    heads_, O_h, Cw, k, _, _ = params['conv_w'].shape
    assert heads_ == heads and Cw == C
    C_out = heads * O_h

    Dp, Hp, Wp = D + 2 * padding, H + 2 * padding, W + 2 * padding
    Sp = Dp * Hp * Wp
    Do = (D + 2 * padding - dilation * (k - 1) - 1) // stride + 1
    Ho = (H + 2 * padding - dilation * (k - 1) - 1) // stride + 1
    Wo = (W + 2 * padding - dilation * (k - 1) - 1) // stride + 1
    K3 = k ** 3

    # ---- BN(eval) affine params, padded/flattened input, validity mask ----
    inv_std = 1.0 / jnp.sqrt(params['var'] + eps)
    scale = (params['gamma'] * inv_std).reshape(C, 1).astype(jnp.float32)
    shift = (params['beta'] - params['mean'] * params['gamma'] * inv_std
             ).reshape(C, 1).astype(jnp.float32)
    xp = jnp.pad(x.astype(jnp.float32),
                 ((0, 0), (0, 0), (padding, padding),
                  (padding, padding), (padding, padding))).reshape(B, C, Sp)
    dv = (jnp.arange(Dp) >= padding) & (jnp.arange(Dp) < padding + D)
    hv = (jnp.arange(Hp) >= padding) & (jnp.arange(Hp) < padding + H)
    wv = (jnp.arange(Wp) >= padding) & (jnp.arange(Wp) < padding + W)
    valid = (dv[:, None, None] & hv[None, :, None] & wv[None, None, :]
             ).reshape(1, Sp).astype(jnp.float32)

    # ---- kernel 1: BN + ReLU + spatial mean, gridded over B ----
    y_p, avg = pl.pallas_call(
        functools.partial(_bn_relu_mean_kernel, inv_count=1.0 / float(D * H * W)),
        out_shape=(jax.ShapeDtypeStruct((B, C, Sp), jnp.float32),
                   jax.ShapeDtypeStruct((B, C, 1), jnp.float32)),
        grid_spec=pltpu.PrefetchScalarGridSpec(
            num_scalar_prefetch=0,
            grid=(B,),
            in_specs=[pl.BlockSpec((1, C, Sp), lambda b: (b, 0, 0)),
                      pl.BlockSpec((C, 1), lambda b: (0, 0)),
                      pl.BlockSpec((C, 1), lambda b: (0, 0)),
                      pl.BlockSpec((1, Sp), lambda b: (0, 0))],
            out_specs=[pl.BlockSpec((1, C, Sp), lambda b: (b, 0, 0)),
                       pl.BlockSpec((1, C, 1), lambda b: (b, 0, 0))],
        ),
        compiler_params=pltpu.CompilerParams(dimension_semantics=("parallel",)),
    )(xp, scale, shift, valid)
    avg = avg.reshape(B, C)

    # ---- per-head squeeze/excite gate (tiny MLP; plain-JAX glue) ----
    h1 = jax.nn.relu(jnp.einsum('bc,hoc->hbo', avg, params['fc1']))
    mask = jax.nn.relu(jnp.einsum('hbo,hco->hbc', h1, params['fc2'])
                       + params['b2'][:, None, :])                 # (heads, B, C)
    if inactive_channels > 0:
        sorted_mask = jnp.sort(mask, axis=-1)
        clamp_max = sorted_mask[..., inactive_channels - 1:inactive_channels]
        mask = jnp.where(mask <= clamp_max, 0.0, mask)

    # ---- fold gate into the (tiny) weights; pre-apply the channel shuffle ----
    # tap order t = kd*k*k + kh*k + kw ; output channel order co = o*heads + h
    w_t = params['conv_w'].transpose(3, 4, 5, 1, 0, 2).reshape(K3, C_out, C)
    mask_co = jnp.broadcast_to(mask.transpose(1, 0, 2)[:, None],
                               (B, O_h, heads, C)).reshape(B, C_out, C)
    wm = (w_t[None] * mask_co[:, None]                           # (B, K3, C_out, C)
          ).transpose(0, 2, 1, 3).reshape(B, C_out, K3 * C).astype(jnp.float32)

    # ---- kernel 2: grouped conv3d, one grid step per batch, heads fused in N ----
    tap_offsets = tuple((kd * dilation) * Hp * Wp + (kh * dilation) * Wp
                        + (kw * dilation)
                        for kd in range(k) for kh in range(k) for kw in range(k))
    l_valid = ((Do - 1) * stride) * Hp * Wp + ((Ho - 1) * stride) * Wp \
        + (Wo - 1) * stride + 1
    out_flat = pl.pallas_call(
        functools.partial(_conv_taps_kernel, tap_offsets=tap_offsets,
                          l_valid=l_valid),
        out_shape=jax.ShapeDtypeStruct((B, C_out, Sp), jnp.float32),
        grid_spec=pltpu.PrefetchScalarGridSpec(
            num_scalar_prefetch=0,
            grid=(B,),
            in_specs=[pl.BlockSpec((1, C, Sp), lambda b: (b, 0, 0)),
                      pl.BlockSpec((1, C_out, K3 * C), lambda b: (b, 0, 0))],
            out_specs=pl.BlockSpec((1, C_out, Sp), lambda b: (b, 0, 0)),
        ),
        compiler_params=pltpu.CompilerParams(dimension_semantics=("parallel",)),
    )(y_p, wm)

    # ---- extract valid output positions (strided view of padded-flat coords) ----
    out = out_flat.reshape(B, C_out, Dp, Hp, Wp)[
        :, :,
        : (Do - 1) * stride + 1: stride,
        : (Ho - 1) * stride + 1: stride,
        : (Wo - 1) * stride + 1: stride]
    return out


# ---------------------------- pure-JAX reference ----------------------------

def reference_forward(x, params, *, heads, stride, padding, dilation,
                      inactive_channels=0):
    eps = 1e-5
    C = x.shape[1]
    g = params['gamma'][None, :, None, None, None]
    b = params['beta'][None, :, None, None, None]
    m = params['mean'][None, :, None, None, None]
    v = params['var'][None, :, None, None, None]
    xr = jax.nn.relu((x - m) / jnp.sqrt(v + eps) * g + b)
    avg = xr.mean(axis=(2, 3, 4))
    h1 = jax.nn.relu(jnp.einsum('bc,hoc->hbo', avg, params['fc1']))
    mask = jax.nn.relu(jnp.einsum('hbo,hco->hbc', h1, params['fc2'])
                       + params['b2'][:, None, :])
    if inactive_channels > 0:
        sorted_mask = jnp.sort(mask, axis=-1)
        clamp_max = sorted_mask[..., inactive_channels - 1:inactive_channels]
        mask = jnp.where(mask <= clamp_max, 0.0, mask)
    x_cat = jnp.concatenate(
        [xr * mask[h][:, :, None, None, None] for h in range(heads)], axis=1)
    heads_, O_h, _, k, _, _ = params['conv_w'].shape
    w_cat = params['conv_w'].reshape(heads * O_h, C, k, k, k)
    out = lax.conv_general_dilated(
        x_cat, w_cat, (stride,) * 3, [(padding, padding)] * 3,
        rhs_dilation=(dilation,) * 3, feature_group_count=heads,
        dimension_numbers=('NCDHW', 'OIDHW', 'NCDHW'))
    b_, c_, s_, hh_, ww_ = out.shape
    out = out.reshape(b_, heads, c_ // heads, s_, hh_, ww_)
    out = out.transpose(0, 2, 1, 3, 4, 5).reshape(b_, c_, s_, hh_, ww_)
    return out


# ---------------------------------- main -------------------------------------

if __name__ == "__main__":
    key = jax.random.PRNGKey(0)
    B, C, D, H, W = 2, 16, 6, 8, 8
    heads = 4
    out_channels = 16
    squeeze_rate = 16
    k = 3
    stride, padding, dilation = 1, 1, 1

    sq = squeeze_rate // 2 if C < 80 else squeeze_rate   # matches HeadConv.__init__
    hidden = C // sq
    O_h = out_channels // heads

    ks = jax.random.split(key, 8)
    x = jax.random.normal(ks[0], (B, C, D, H, W), jnp.float32)
    params = dict(
        gamma=1.0 + 0.1 * jax.random.normal(ks[1], (C,), jnp.float32),
        beta=0.1 * jax.random.normal(ks[2], (C,), jnp.float32),
        mean=0.1 * jax.random.normal(ks[3], (C,), jnp.float32),
        var=jax.nn.softplus(jax.random.normal(ks[4], (C,), jnp.float32)) + 0.5,
        fc1=jax.random.normal(ks[5], (heads, hidden, C), jnp.float32)
            * (2.0 / C) ** 0.5,                                  # kaiming-style
        fc2=jax.random.normal(ks[6], (heads, C, hidden), jnp.float32)
            * (2.0 / max(hidden, 1)) ** 0.5,
        b2=jnp.ones((heads, C), jnp.float32),                    # fc2 bias = 1.0
        conv_w=0.1 * jax.random.normal(ks[7], (heads, O_h, C, k, k, k),
                                       jnp.float32),
    )

    out = dynamic_multi_head_conv(x, params, heads=heads, stride=stride,
                                  padding=padding, dilation=dilation,
                                  inactive_channels=0)
    out = jax.block_until_ready(out)

    ref = reference_forward(x, params, heads=heads, stride=stride,
                            padding=padding, dilation=dilation,
                            inactive_channels=0)
    assert out.shape == (B, out_channels, D, H, W), out.shape
    assert jnp.allclose(out, ref, rtol=2e-2, atol=2e-2), \
        float(jnp.max(jnp.abs(out - ref)))
    print("KERNEL_OK")
</pallas_src>

<mosaic_0001>
module attributes {stable_mosaic.version = 11 : i64} {
  func.func @_bn_relu_mean_kernel(%arg0: i32, %arg1: memref<1x16x800xf32, #tpu.memory_space<vmem>>, %arg2: memref<16x1xf32, #tpu.memory_space<vmem>>, %arg3: memref<16x1xf32, #tpu.memory_space<vmem>>, %arg4: memref<1x800xf32, #tpu.memory_space<vmem>>, %arg5: memref<1x16x800xf32, #tpu.memory_space<vmem>>, %arg6: memref<1x16x1xf32, #tpu.memory_space<vmem>>) attributes {dimension_semantics = [#tpu.dimension_semantics<parallel>], iteration_bounds = array<i64: 2>, scalar_prefetch = 0 : i64, scratch_operands = 0 : i64, tpu.core_type = #tpu.core_type<tc>, window_params = [{transform_indices = @transform_0, window_bounds = array<i64: 1, 16, 800>}, {pipeline_mode = #tpu.pipeline_mode<synchronous>, transform_indices = @transform_1, window_bounds = array<i64: 16, 1>}, {pipeline_mode = #tpu.pipeline_mode<synchronous>, transform_indices = @transform_2, window_bounds = array<i64: 16, 1>}, {pipeline_mode = #tpu.pipeline_mode<synchronous>, transform_indices = @transform_3, window_bounds = array<i64: 1, 800>}, {transform_indices = @transform_4, window_bounds = array<i64: 1, 16, 800>}, {transform_indices = @transform_5, window_bounds = array<i64: 1, 16, 1>}]} {
    %c0 = arith.constant 0 : index
    %c0_0 = arith.constant 0 : index
    %c0_1 = arith.constant 0 : index
    %0 = vector.load %arg1[%c0, %c0_0, %c0_1] : memref<1x16x800xf32, #tpu.memory_space<vmem>>, vector<1x16x800xf32>
    %1 = vector.shape_cast %0 : vector<1x16x800xf32> to vector<16x800xf32>
    %c0_2 = arith.constant 0 : index
    %c0_3 = arith.constant 0 : index
    %2 = vector.load %arg2[%c0_2, %c0_3] : memref<16x1xf32, #tpu.memory_space<vmem>>, vector<16x1xf32>
    %3 = vector.broadcast %2 : vector<16x1xf32> to vector<16x800xf32>
    %4 = arith.mulf %1, %3 : vector<16x800xf32>
    %c0_4 = arith.constant 0 : index
    %c0_5 = arith.constant 0 : index
    %5 = vector.load %arg3[%c0_4, %c0_5] : memref<16x1xf32, #tpu.memory_space<vmem>>, vector<16x1xf32>
    %6 = vector.broadcast %5 : vector<16x1xf32> to vector<16x800xf32>
    %7 = arith.addf %4, %6 : vector<16x800xf32>
    %cst = arith.constant 0.000000e+00 : f32
    %8 = vector.broadcast %cst : f32 to vector<16x800xf32>
    %9 = arith.maximumf %7, %8 : vector<16x800xf32>
    %c0_6 = arith.constant 0 : index
    %c0_7 = arith.constant 0 : index
    %10 = vector.load %arg4[%c0_6, %c0_7] : memref<1x800xf32, #tpu.memory_space<vmem>>, vector<1x800xf32>
    %11 = vector.broadcast %10 : vector<1x800xf32> to vector<16x800xf32>
    %12 = arith.mulf %9, %11 : vector<16x800xf32>
    %c0_8 = arith.constant 0 : index
    %c0_9 = arith.constant 0 : index
    %c0_10 = arith.constant 0 : index
    %13 = vector.load %arg5[%c0_8, %c0_9, %c0_10] : memref<1x16x800xf32, #tpu.memory_space<vmem>>, vector<1x16x800xf32>
    %14 = vector.shape_cast %13 : vector<1x16x800xf32> to vector<16x800xf32>
    %15 = vector.shape_cast %12 : vector<16x800xf32> to vector<1x16x800xf32>
    tpu.vector_store %arg5[%c0_8, %c0_9, %c0_10], %15 {strides = array<i32>} : memref<1x16x800xf32, #tpu.memory_space<vmem>>, vector<1x16x800xf32>,
    %cst_11 = arith.constant dense<0.000000e+00> : vector<16xf32>
    %16 = vector.multi_reduction <add>, %12, %cst_11 [1] : vector<16x800xf32> to vector<16xf32>
    %17 = vector.shape_cast %16 : vector<16xf32> to vector<16x1xf32>
    %cst_12 = arith.constant 0.00260416674 : f32
    %18 = vector.broadcast %cst_12 : f32 to vector<16x1xf32>
    %19 = arith.mulf %17, %18 : vector<16x1xf32>
    %c0_13 = arith.constant 0 : index
    %c0_14 = arith.constant 0 : index
    %c0_15 = arith.constant 0 : index
    %20 = vector.load %arg6[%c0_13, %c0_14, %c0_15] : memref<1x16x1xf32, #tpu.memory_space<vmem>>, vector<1x16x1xf32>
    %21 = vector.shape_cast %20 : vector<1x16x1xf32> to vector<16x1xf32>
    %22 = vector.shape_cast %19 : vector<16x1xf32> to vector<1x16x1xf32>
    tpu.vector_store %arg6[%c0_13, %c0_14, %c0_15], %22 {strides = array<i32>} : memref<1x16x1xf32, #tpu.memory_space<vmem>>, vector<1x16x1xf32>,
    return
  }
  func.func @transform_0(%arg0: i32) -> (i32, i32, i32) {
    %c0_i32 = arith.constant 0 : i32
    %c0_i32_0 = arith.constant 0 : i32
    %c0_i32_1 = arith.constant 0 : i32
    return %arg0, %c0_i32, %c0_i32_0 : i32, i32, i32
  }
  func.func @transform_1(%arg0: i32) -> (i32, i32) {
    %c0_i32 = arith.constant 0 : i32
    %c0_i32_0 = arith.constant 0 : i32
    %c0_i32_1 = arith.constant 0 : i32
    return %c0_i32, %c0_i32_0 : i32, i32
  }
  func.func @transform_2(%arg0: i32) -> (i32, i32) {
    %c0_i32 = arith.constant 0 : i32
    %c0_i32_0 = arith.constant 0 : i32
    %c0_i32_1 = arith.constant 0 : i32
    return %c0_i32, %c0_i32_0 : i32, i32
  }
  func.func @transform_3(%arg0: i32) -> (i32, i32) {
    %c0_i32 = arith.constant 0 : i32
    %c0_i32_0 = arith.constant 0 : i32
    %c0_i32_1 = arith.constant 0 : i32
    return %c0_i32, %c0_i32_0 : i32, i32
  }
  func.func @transform_4(%arg0: i32) -> (i32, i32, i32) {
    %c0_i32 = arith.constant 0 : i32
    %c0_i32_0 = arith.constant 0 : i32
    %c0_i32_1 = arith.constant 0 : i32
    return %arg0, %c0_i32, %c0_i32_0 : i32, i32, i32
  }
  func.func @transform_5(%arg0: i32) -> (i32, i32, i32) {
    %c0_i32 = arith.constant 0 : i32
    %c0_i32_0 = arith.constant 0 : i32
    %c0_i32_1 = arith.constant 0 : i32
    return %arg0, %c0_i32, %c0_i32_0 : i32, i32, i32
  }
}

</mosaic_0001>

<bundles_post_ra>
// kernel: tpu_custom_call.1
= control target key start
LH: loop header
LB: loop body
LE: loop exit
PB: predicated region body
PF: predicated region fallthrough
CT: control target
= control target key end

     0   :  { %11 = vsyncpa [#allocation3], 0  ;;  %s944_s0 = inlined_call_operand.hbm [shape: f32[2,16,800], index: 0, kind: input, shape index: {}]   ;;  %s945_s1 = inlined_call_operand.vmem [shape: f32[16,1], index: 1, kind: input, shape index: {}]   ;;  %s946_s2 = inlined_call_operand.vmem [shape: f32[16,1], index: 2, kind: input, shape index: {}]   ;;  %s947_s3 = inlined_call_operand.vmem [shape: f32[1,800], index: 3, kind: input, shape index: {}]   ;;  %s948_s4 = inlined_call_operand.hbm [shape: f32[2,16,800], index: 4, kind: output, shape index: {0}]   ;;  %s949_s5 = inlined_call_operand.vmem [shape: f32[2,16,1], index: 5, kind: output, shape index: {1}]  }
   0x1   :  { %13 = vsyncpa [#allocation3 + $0x1], 0 }
   0x2   :  { %14 = vsyncpa [#allocation4], 0 }
   0x3   :  { %16 = vsyncpa [#allocation4 + $0x1], 0  ;;  %s729_s18 = smov 0   ;;  %s731_s19 = smov 0  }
   0x4   :  { %s733_s20 = smov 0   ;;  %s735_s21 = smov 0  }
   0x5 LB: > { %s750_s22 = sadd.s32 4294967295, %s692_s21   ;;  %s528_s23 = sadd.s32 4294967294, %s692_s21   ;;  %s692_s21 = sphi %s735_s21, %s957_s21   ;;  %s688_s20 = sphi %s733_s20, %s956_s20   ;;  %s684_s19 = sphi %s731_s19, %s955_s19   ;;  %s680_s18 = sphi %s729_s18, %s954_s18  }
   0x6   : > { %s754_s24 = sadd.s32 1, %s692_s21   ;;  %s29_s25 = sadd.s32 1, %s688_s20 }
   0x7   : > { %s26_s26 = ssub.s32 %s692_s21, %s754_s24  ;;  %p36_p0 = scmp.ne.s32.totalorder %s688_s20, %s684_s19 }
   0x8   : > { %p27_p1 = scmp.eq.s32.totalorder %s26_s26, 0  ;;  %p37_p2 = scmp.eq.s32.totalorder %s692_s21, 0 }
   0x9   : > { %p42_p3 = scmp.ne.s32.totalorder %s684_s19, %s680_s18  ;;  %p43_p4 = scmp.eq.s32.totalorder %s750_s22, 0 }
   0xa   : > { %s766_s27 = scalar_select %p27_p1, %s688_s20, %s29_s25  }
   0xb   : > { %p38_p5 = por %p37_p2, %p36_p0  ;;  %p768_p6 = por %p43_p4, %p42_p3 }
   0xc   : > { %p129_p7 = scmp.eq.s32.totalorder %s750_s22, 1  ;;  %p135_p8 = scmp.eq.s32.totalorder %s528_s23, 1 }
   0xd   : > { %p530_p9 = scmp.ge.s32.totalorder %s692_s21, 2  ;;  %p555_p10 = scmp.lt.s32.totalorder %s692_s21, 2 }
   0xe   : > { %p775_p11 = por %p129_p7, %p36_p0  ;;  %p779_p12 = por %p135_p8, %p42_p3 }
   0xf   : > { %s190_s6 = sand.u32 1, %s688_s20   ;;  %s540_s7 = smul.u32 112, %s692_s21 }
  0x10   : > { %s539_s8 = smul.u32 112, %s190_s6  ;;  %p788_p13 = pnand %p555_p10, %p38_p5 }
  0x11   : > { %s199_s11 = scalar_lea.hbm %s944_s0, %s540_s7  ;;  %s191_s16 = scalar_lea.sflag [#allocation3], %s190_s6 }
  0x12   : > { %s200_s13 = sshll.u32 %s199_s11, 4  ;;  %s194_s14 = scalar_lea.vmem [#allocation2], %s539_s8  ;;  %s201_s13 = int_to_ptr.hbm [resolvable:$true] %s200_s13 }
  0x13   : > { %s202_s15 = sshll.u32 %s194_s14, 4  ;;  %s596_s17 = sshra.s32 %s201_s13, 4  ;;  %s203_s15 = int_to_ptr.vmem [resolvable:$true] %s202_s15  ;;  %s597_s17 = int_to_ptr.hbm [resolvable:$true] %s596_s17 }
  0x14   : > { %s598_s23 = scalar_lea.hbm %s597_s17, 112  ;;  %p600_p1 = pneg %p788_p13 }
  0x15   : > { %p599_p0 = scmp.ne.s32.totalorder %s597_s17, %s598_s23  ;;  %s603_s7 = scalar_lea.hbm %s944_s0, 224 }
  0x16   : > { %p604_p4 = scmp.lt.s32.totalorder %s597_s17, %s944_s0  ;;  %p605_p5 = scmp.lt.s32.totalorder %s603_s7, %s598_s23 }
  0x17   : > { %p601_p2 = pnand %p600_p1, %p599_p0 }
  0x18   : > { %p606_p7 = por %p605_p5, %p604_p4 }
  0x19   : > { %p602_p3 = pneg %p601_p2 }
  0x1b   : > { %p607_p8 = pnand %p606_p7, %p602_p3 }
  0x1d   : > { %610 = shalt.err (!%p607_p8)
}
  0x1e   : > { %s694_s6 = smov 896   ;;  %s695_s8 = smov 56  }
  0x1f   : > { %550 = dma.hbm_to_vmem [thread:$0]  (!%p788_p13), %s201_s13, 1792, %s203_s15, %s191_s16, %s694_s6, %s694_s6, %s695_s8  }
  0x20   : > { %p532_p10 = scmp.ge.s32.totalorder %s692_s21, 1  ;;  %p210_p0 = scmp.lt.s32.totalorder %s692_s21, 3 }
  0x22   : > { %p211_p1 = pnand %p532_p10, %p210_p0 }
  0x23   : > { %s805_s11 = sand.u32 (!%p211_p1), 1, %s684_s19  }
  0x24   : > { %214 = sbr.rel (%p211_p1) target bundleno = 307 (0x133), region = 36  ;;  %s217_s17 = scalar_lea.sflag (!%p211_p1), [#allocation3], %s805_s11 }
  0x25   : > { %s541_s14 = smul.u32 (!%p211_p1), 112, %s805_s11 }
  0x27   : > { %s811_s23 = scalar_lea.vmem (!%p211_p1), [#allocation2], %s541_s14 }
  0x29   : > { %671 = dma.done.wait (%p768_p6), %s217_s17, 1792  }
  0x2a   : > { %673 = vsyncadd (%p768_p6), %s217_s17, 4294965504  ;;  %v696_v0 = vmov 0   ;;  %v298_v1 = vld [vmem:[%s946_s2] sm:$0xff]  ;;  %v299_v3 = vld [vmem:[%s946_s2 + $0x8] sm:$0xff]  ;;  %vm374_vm0 = vcmask 261120   ;;  %s869_s6 = scalar_lea.vmem [#allocation5], %s541_s14 }
  0x2b   : > { %595 = vset.pattern.permute.xlu1 %v696_v0  ;;  %594 = vset.pattern.permute.xlu0 %v696_v0  ;;  %v272_v2 = vld [vmem:[%s945_s1] sm:$0xff]  ;;  %v273_v4 = vld [vmem:[%s945_s1 + $0x8] sm:$0xff]  ;;  %s542_s8 = smul.u32 112, %s750_s22  ;;  %s424_s14 = sshll.u32 %s869_s6, 4  ;;  %s425_s14 = int_to_ptr.vmem [resolvable:$true] %s424_s14 }
  0x2c   : > { %302 = vperm.xlu1 %595, %v298_v1   ;;  %276 = vperm.xlu0 %594, %v272_v2   ;;  %v832_v5 = vld [vmem:[%s947_s3] sm:$0x7f]  ;;  %v259_v7 = vld [vmem:[%s811_s23 + $0x8] sm:$0xff]  ;;  %v261_v9 = vld [vmem:[%s811_s23 + $0x18] sm:$0xff]  ;;  %s407_s15 = scalar_lea.sflag [#allocation4], %s805_s11  ;;  %s646_s7 = scalar_lea.hbm %s948_s4, 224 }
  0x2d   : > { %v258_v6 = vld [vmem:[%s811_s23] sm:$0xff]  ;;  %v260_v8 = vld [vmem:[%s811_s23 + $0x10] sm:$0xff]  ;;  %v263_v11 = vld [vmem:[%s811_s23 + $0x28] sm:$0xff]  ;;  %v340_v13 = vperm.slane %v832_v5, 0  ;;  %v341_v16 = vperm.slane %v832_v5, 1  ;;  %v342_v17 = vperm.slane %v832_v5, 2  ;;  %s423_s12 = scalar_lea.hbm %s948_s4, %s542_s8 }
  0x2e   : > { %v262_v10 = vld [vmem:[%s811_s23 + $0x20] sm:$0xff]  ;;  %v264_v12 = vld [vmem:[%s811_s23 + $0x30] sm:$0xff]  ;;  %v343_v18 = vperm.slane %v832_v5, 3  ;;  %v344_v19 = vperm.slane %v832_v5, 4  ;;  %v345_v27 = vperm.slane %v832_v5, 5  ;;  %v346_v35 = vperm.slane %v832_v5, 6 }
  0x2f   : > { %v265_v36 = vld [vmem:[%s811_s23 + $0x38] sm:$0xff]  ;;  %v266_v41 = vld [vmem:[%s811_s23 + $0x40] sm:$0xff]  ;;  %v267_v42 = vld [vmem:[%s811_s23 + $0x48] sm:$0xff]  ;;  %s426_s13 = sshll.u32 %s423_s12, 4  ;;  %s427_s13 = int_to_ptr.hbm [resolvable:$true] %s426_s13 }
  0x30   : > { %v268_v43 = vld [vmem:[%s811_s23 + $0x50] sm:$0xff]  ;;  %v269_v47 = vld [vmem:[%s811_s23 + $0x58] sm:$0xff]  ;;  %v270_v52 = vld [vmem:[%s811_s23 + $0x60] sm:$0xff]  ;;  %s640_s16 = sshra.s32 %s427_s13, 4  ;;  %s641_s16 = int_to_ptr.hbm [resolvable:$true] %s640_s16 }
  0x31   : > { %v271_v56 = vld [vmem:[%s811_s23 + $0x68] sm:$0xff]  ;;  %s642_s28 = scalar_lea.hbm %s641_s16, 112  ;;  %p647_p3 = scmp.lt.s32.totalorder %s641_s16, %s948_s4 }
  0x32   : > { %p643_p6 = scmp.ne.s32.totalorder %s641_s16, %s642_s28  ;;  %p648_p4 = scmp.lt.s32.totalorder %s646_s7, %s642_s28 }
  0x34   : > { %307 = vperm.xlu1 %595, %v299_v3   ;;  %281 = vperm.xlu0 %594, %v273_v4   ;;  %p644_p13 = pnand %p643_p6, %p775_p11  ;;  %p649_p5 = por %p648_p4, %p647_p3 }
  0x36   : > { %p645_p2 = pneg %p644_p13 }
  0x38   : > { %p650_p7 = pnand %p649_p5, %p645_p2 }
  0x9e   : > { %v303_v14 = vpop.permute.xlu1 %302  ;;  %v277_v15 = vpop.permute.xlu0 %276 }
  0x9f   : > { %v284_v20 = vmul.f32 %v277_v15, %v258_v6  ;;  %v285_v21 = vmul.f32 %v277_v15, %v259_v7  ;;  %v286_v22 = vmul.f32 %v277_v15, %v260_v8  ;;  %v287_v23 = vmul.f32 %v277_v15, %v261_v9 }
  0xa0   : > { %v288_v24 = vmul.f32 %v277_v15, %v262_v10  ;;  %v289_v25 = vmul.f32 %v277_v15, %v263_v11  ;;  %v290_v26 = vmul.f32 %v277_v15, %v264_v12 }
  0xa1   : > { %v310_v28 = vadd.f32 %v303_v14, %v284_v20  ;;  %v311_v29 = vadd.f32 %v303_v14, %v285_v21  ;;  %v312_v30 = vadd.f32 %v303_v14, %v286_v22  ;;  %v313_v31 = vadd.f32 %v303_v14, %v287_v23 }
  0xa2   : > { %v314_v32 = vadd.f32 %v303_v14, %v288_v24  ;;  %v315_v33 = vadd.f32 %v303_v14, %v289_v25  ;;  %v316_v34 = vadd.f32 %v303_v14, %v290_v26 }
  0xa3   : > { %v324_v37 = vmax.f32 %v310_v28, 0.0  ;;  %v325_v38 = vmax.f32 %v311_v29, 0.0  ;;  %v326_v39 = vmax.f32 %v312_v30, 0.0  ;;  %v327_v40 = vmax.f32 %v313_v31, 0.0 }
  0xa4   : > { %v328_v44 = vmax.f32 %v314_v32, 0.0  ;;  %v329_v45 = vmax.f32 %v315_v33, 0.0  ;;  %v330_v46 = vmax.f32 %v316_v34, 0.0 }
  0xa5   : > { %v354_v48 = vmul.f32 %v340_v13, %v324_v37  ;;  %v355_v49 = vmul.f32 %v341_v16, %v325_v38  ;;  %v356_v50 = vmul.f32 %v342_v17, %v326_v39  ;;  %v357_v51 = vmul.f32 %v343_v18, %v327_v40 }
  0xa6   : > { %v282_v53 = vpop.permute.xlu0 %281  ;;  %v358_v54 = vmul.f32 %v344_v19, %v328_v44  ;;  %v359_v55 = vmul.f32 %v345_v27, %v329_v45  ;;  %v308_v61 = vpop.permute.xlu1 %307  ;;  %v360_v63 = vmul.f32 %v346_v35, %v330_v46 }
  0xa7   : > { %v291_v57 = vmul.f32 %v282_v53, %v265_v36  ;;  %v292_v58 = vmul.f32 %v282_v53, %v266_v41  ;;  %v293_v59 = vmul.f32 %v282_v53, %v267_v42  ;;  %v294_v60 = vmul.f32 %v282_v53, %v268_v43  ;;  %369 = vst [vmem:[%s869_s6 + $0x8] sm:$0xff] %v355_v49 }
  0xa8   : > { %v295_v62 = vmul.f32 %v282_v53, %v269_v47  ;;  %370 = vst [vmem:[%s869_s6 + $0x10] sm:$0xff] %v356_v50  ;;  %v383_v0 = vadd.f32 %v355_v49, %v354_v48  ;;  %v296_v1 = vmul.f32 %v282_v53, %v270_v52  ;;  %v297_v6 = vmul.f32 %v282_v53, %v271_v56 }
  0xa9   : > { %v317_v2 = vadd.f32 %v308_v61, %v291_v57  ;;  %v318_v3 = vadd.f32 %v308_v61, %v292_v58  ;;  %v319_v4 = vadd.f32 %v308_v61, %v293_v59  ;;  %371 = vst [vmem:[%s869_s6 + $0x18] sm:$0xff] %v357_v51  ;;  %v320_v8 = vadd.f32 %v308_v61, %v294_v60 }
  0xaa   : > { %372 = vst [vmem:[%s869_s6 + $0x20] sm:$0xff] %v358_v54  ;;  %v384_v7 = vadd.f32 %v383_v0, %v356_v50  ;;  %v321_v9 = vadd.f32 %v308_v61, %v295_v62  ;;  %v322_v10 = vadd.f32 %v308_v61, %v296_v1  ;;  %v323_v14 = vadd.f32 %v308_v61, %v297_v6 }
  0xab   : > { %v331_v11 = vmax.f32 %v317_v2, 0.0  ;;  %v332_v12 = vmax.f32 %v318_v3, 0.0  ;;  %373 = vst [vmem:[%s869_s6 + $0x28] sm:$0xff] %v359_v55  ;;  %v333_v15 = vmax.f32 %v319_v4, 0.0  ;;  %v334_v21 = vmax.f32 %v320_v8, 0.0 }
  0xac   : > { %375 = vst.msk [vmem:[%s869_s6 + $0x30] sm:$0xff] %vm374_vm0, %v360_v63  ;;  %v385_v20 = vadd.f32 %v384_v7, %v357_v51  ;;  %v335_v22 = vmax.f32 %v321_v9, 0.0  ;;  %v336_v23 = vmax.f32 %v322_v10, 0.0  ;;  %v337_v24 = vmax.f32 %v323_v14, 0.0 }
  0xad   : > { %368 = vst [vmem:[%s869_s6] sm:$0xff] %v354_v48  ;;  %v361_v25 = vmul.f32 %v340_v13, %v331_v11  ;;  %v362_v26 = vmul.f32 %v341_v16, %v332_v12  ;;  %v363_v28 = vmul.f32 %v342_v17, %v333_v15  ;;  %v364_v30 = vmul.f32 %v343_v18, %v334_v21 }
  0xae   : > { %v386_v29 = vadd.f32 %v385_v20, %v358_v54  ;;  %v365_v31 = vmul.f32 %v344_v19, %v335_v22  ;;  %v366_v16 = vmul.f32 %v345_v27, %v336_v23  ;;  %v388_v17 = vsel %vm374_vm0, %v360_v63, 0.0 }
  0xaf   : > { %376 = vst [vmem:[%s869_s6 + $0x38] sm:$0xff] %v361_v25  ;;  %v392_v13 = vadd.f32 %v362_v26, %v361_v25  ;;  %v367_v33 = vmul.f32 %v346_v35, %v337_v24 }
  0xb0   : > { %v387_v32 = vadd.f32 %v386_v29, %v359_v55  ;;  %377 = vst [vmem:[%s869_s6 + $0x40] sm:$0xff] %v362_v26 }
  0xb1   : > { %378 = vst [vmem:[%s869_s6 + $0x48] sm:$0xff] %v363_v28  ;;  %v393_v18 = vadd.f32 %v392_v13, %v363_v28 }
  0xb2   : > { %v389_v34 = vadd.f32 %v388_v17, %v387_v32  ;;  %379 = vst [vmem:[%s869_s6 + $0x50] sm:$0xff] %v364_v30 }
  0xb3   : > { %380 = vst [vmem:[%s869_s6 + $0x58] sm:$0xff] %v365_v31  ;;  %v394_v19 = vadd.f32 %v393_v18, %v364_v30 }
  0xb4   : > { %390 = vadd.xlane.f32.xlu2 %v389_v34  ;;  %381 = vst [vmem:[%s869_s6 + $0x60] sm:$0xff] %v366_v16 }
  0xb5   : > { %382 = vst.msk [vmem:[%s869_s6 + $0x68] sm:$0xff] %vm374_vm0, %v367_v33  ;;  %v395_v5 = vadd.f32 %v394_v19, %v365_v31 }
  0xb7   : > { %v396_v27 = vadd.f32 %v395_v5, %v366_v16 }
  0xb8   : > { %653 = shalt.err (!%p650_p7)
}
  0xb9   : > { %s697_s11 = smov 896   ;;  %s698_s6 = smov 56   ;;  %v397_v35 = vsel %vm374_vm0, %v367_v33, 0.0  ;;  %vm403_vm1 = vcmask 7168  }
  0xba   : > { %545 = dma.vmem_to_hbm [thread:$0]  (%p775_p11), %s425_s14, 1792, %s427_s13, %s407_s15, %s697_s11, %s697_s11, %s698_s6   ;;  %v398_v36 = vadd.f32 %v397_v35, %v396_v27 }
  0xbb   : > { %p253_p8 = scmp.lt.s32.totalorder %s750_s22, 1 }
  0xbc   : > { %399 = vadd.xlane.f32.xlu2 %v398_v36 }
  0xbd   : > { %s959_s22 = smov (!%p253_p8, %s750_s22), 1 }
  0xbe   : > { %s538_s8 = sshll.u32 %s959_s22, 4 }
  0xbf   : > { %s257_s12 = scalar_lea.vmem %s949_s5, %s538_s8 }
 0x127   : > { %v391_v37 = vpop.xlane.xlu2 %390 }
 0x128   : > { %v401_v38 = vmul.f32 0.0026041667, %v391_v37 }
 0x12a   : > { %404 = vst.msk [vmem:[%s257_s12] sm:$0xff] %vm403_vm1, %v401_v38 }
 0x12f   : > { %v400_v39 = vpop.xlane.xlu2 %399 }
 0x130   : > { %v402_v40 = vmul.f32 0.0026041667, %v400_v39 }
 0x132   : > { %405 = vst.msk [vmem:[%s257_s12 + $0x8] sm:$0xff] %vm403_vm1, %v402_v40 }
 0x133 PF: > { %s444_s29 = sand.u32 1, %s680_s18   ;;  %p552_p11 = pnand %p530_p9, %p779_p12 }
 0x134   : > { %s445_s22 = scalar_lea.sflag [#allocation4], %s444_s29 }
 0x135   : > { %p553_p10 = pneg %p552_p11 }
 0x137   : > { %675 = dma.done.wait (%p553_p10), %s445_s22, 1792  }
 0x138   : > { %677 = vsyncadd (%p553_p10), %s445_s22, 4294965504  ;;  %p19_p0 = scmp.ge.s32.totalorder %s754_s24, 4   ;;  %s954_s18 = smov %s684_s19 }
 0x139   : > { %s955_s19 = smov %s688_s20  ;;  %s956_s20 = smov %s766_s27 }
 0x13a   : > { %s957_s21 = smov %s754_s24  ;;  %21 = sbr.rel (!%p19_p0) target bundleno = 5 (0x5), region = 93 }
 0x13f   :  { %459 = vsyncpa [#allocation3], 1 }
 0x140   :  { %461 = vsyncpa [#allocation3 + $0x1], 1 }
 0x141   :  { %462 = vsyncpa [#allocation4], 1 }
 0x142   :  { %464 = vsyncpa [#allocation4 + $0x1], 1 }

</bundles_post_ra>
